<compile_context>
chip_gen: v6e
topology: v6e:2x2x1
jax: 0.10.0
libtpu: 0.0.40
codegen_flags: <defaults>
</compile_context>

<pallas_src>
import jax
import jax.numpy as jnp
from jax.experimental import pallas as pl
from jax.experimental.pallas import tpu as pltpu


def _round_up(x, m):
    return ((x + m - 1) // m) * m


# ----------------------------------------------------------------------------- kernel
def neumf_kernel(u_mlp_ref, i_mlp_ref, u_gmf_ref, i_gmf_ref,
                 w1u_ref, w1i_ref, b1_ref,
                 w2_ref, b2_ref,
                 w3f_ref, wgf_ref, bf_ref,
                 out_ref):
    f32 = jnp.float32

    u_mlp = u_mlp_ref[...]
    i_mlp = i_mlp_ref[...]
    u_gmf = u_gmf_ref[...]
    i_gmf = i_gmf_ref[...]

    # ---- MLP branch ----
    # torch.cat([u_mlp, i_mlp], dim=1) @ W1  ==  u_mlp @ W1[:D] + i_mlp @ W1[D:]
    # (split in the wrapper; avoids an in-kernel lane concat).
    h = (jnp.dot(u_mlp, w1u_ref[...], preferred_element_type=f32) +
         jnp.dot(i_mlp, w1i_ref[...], preferred_element_type=f32) +
         b1_ref[...])
    h = jnp.maximum(h, 0.0)          # ReLU (Dropout is identity in eval mode)
    h = jnp.dot(h, w2_ref[...], preferred_element_type=f32) + b2_ref[...]
    h = jnp.maximum(h, 0.0)          # ReLU (Dropout is identity in eval mode)

    # ---- GMF branch (elementwise product, VPU) ----
    gmf = u_gmf * i_gmf

    # ---- folded tail: (h @ w3 + b3, gmf @ w_gmf + b_gmf) @ w_final + b_final ----
    # w3f = w3 @ w_final[:D/2], wgf = w_gmf @ w_final[D/2:]  (folded in wrapper).
    # VPU multiply + XLU lane reduce instead of three lane-sparse MXU pushes.
    out = (jnp.sum(h * w3f_ref[...], axis=-1, keepdims=True) +
           jnp.sum(gmf * wgf_ref[...], axis=-1, keepdims=True) +
           bf_ref[...])
    out_ref[...] = out


# ----------------------------------------------------------------------------- params
def _xavier_uniform(key, in_dim, out_dim):
    # matches nn.init.xavier_uniform_ on a [out_dim, in_dim] torch weight,
    # but stored here as [in_dim, out_dim]
    bound = jnp.sqrt(6.0 / (in_dim + out_dim))
    return jax.random.uniform(key, (in_dim, out_dim), jnp.float32, -bound, bound)


def init_neumf_params(key, n_users, n_items, embedding_dim):
    D = embedding_dim
    Dh = D // 2
    ks = jax.random.split(key, 9)
    params = {
        "user_emb_mlp": 0.01 * jax.random.normal(ks[0], (n_users, D), jnp.float32),
        "item_emb_mlp": 0.01 * jax.random.normal(ks[1], (n_items, D), jnp.float32),
        "user_emb_gmf": 0.01 * jax.random.normal(ks[2], (n_users, D), jnp.float32),
        "item_emb_gmf": 0.01 * jax.random.normal(ks[3], (n_items, D), jnp.float32),
        "w_gmf": _xavier_uniform(ks[4], D, Dh),
        "b_gmf": jnp.zeros((1, Dh), jnp.float32),
        "w1": _xavier_uniform(ks[5], 2 * D, D),
        "b1": jnp.zeros((1, D), jnp.float32),
        "w2": _xavier_uniform(ks[6], D, D),
        "b2": jnp.zeros((1, D), jnp.float32),
        "w3": _xavier_uniform(ks[7], D, Dh),
        "b3": jnp.zeros((1, Dh), jnp.float32),
        "w_final": _xavier_uniform(ks[8], D, 1),
        "b_final": jnp.zeros((1, 1), jnp.float32),
    }
    return params


# ----------------------------------------------------------------------------- wrapper
_VMEM_LIMIT_BYTES = 32 * 1024 * 1024   # scoped-VMEM safe on v5e/v6e/v7x


def _pick_tile_b(D, vmem_limit_bytes=_VMEM_LIMIT_BYTES, max_tile=4096):
    """Largest batch tile whose double-buffered activations fit the VMEM budget."""
    weight_bytes = 2 * (3 * D * D + 4 * D + 1) * 4        # resident weights (2 bufs, tiny)
    budget = max(vmem_limit_bytes - weight_bytes - (4 << 20), 1 << 20)
    bytes_per_row = (4 * D + 1) * 4 * 2                    # 4 act inputs + out col, 2 bufs
    cap = max(8, (budget // bytes_per_row) // 8 * 8)
    return int(min(max_tile, cap))


def neumf_forward(params, users, items, *, tile_b=None):
    D = params["user_emb_mlp"].shape[1]
    assert D % 2 == 0, "embedding_dim must be even (linear_final splits D into 2*D/2)"
    Dh = D // 2
    B = users.shape[0]

    # --- batch tiling: largest VMEM-feasible tile, padded batch ---
    if tile_b is None:
        tile_b = _pick_tile_b(D)
    tile_b = max(8, min(int(tile_b), _round_up(B, 8)))
    tile_b = _round_up(tile_b, 8)            # sublane alignment for the block shape
    b_pad = _round_up(B, tile_b)
    n_tiles = b_pad // tile_b

    if b_pad != B:
        pad = b_pad - B
        users = jnp.concatenate([users, jnp.zeros((pad,), users.dtype)])
        items = jnp.concatenate([items, jnp.zeros((pad,), items.dtype)])

    # Embedding gathers (plain-JAX glue; see TODO at top of file).
    u_mlp = jnp.take(params["user_emb_mlp"], users, axis=0)
    i_mlp = jnp.take(params["item_emb_mlp"], items, axis=0)
    u_gmf = jnp.take(params["user_emb_gmf"], users, axis=0)
    i_gmf = jnp.take(params["item_emb_gmf"], items, axis=0)

    # Split W1 to avoid an in-kernel concatenation of the two MLP embeddings.
    w1u = params["w1"][:D, :]
    w1i = params["w1"][D:, :]

    # Fold the lane-sparse tail: (x @ A + a) @ c == x @ (A @ c) + a @ c.
    wf_mlp = params["w_final"][:Dh, :]       # [Dh, 1]
    wf_gmf = params["w_final"][Dh:, :]       # [Dh, 1]
    w3f = (params["w3"] @ wf_mlp).T          # [1, D]
    wgf = (params["w_gmf"] @ wf_gmf).T       # [1, D]
    b_fold = (params["b3"] @ wf_mlp +
              params["b_gmf"] @ wf_gmf +
              params["b_final"])             # [1, 1]

    act_spec = pl.BlockSpec((tile_b, D), lambda i: (i, 0))
    const = lambda shape: pl.BlockSpec(shape, lambda i: (0, 0))

    inputs = (u_mlp, i_mlp, u_gmf, i_gmf,
              w1u, w1i, params["b1"],
              params["w2"], params["b2"],
              w3f, wgf, b_fold)
    in_specs = [act_spec, act_spec, act_spec, act_spec,
                const((D, D)), const((D, D)), const((1, D)),
                const((D, D)), const((1, D)),
                const((1, D)), const((1, D)), const((1, 1))]

    cost = pl.CostEstimate(
        flops=int(6 * b_pad * D * D + 6 * b_pad * D),          # 3 DxD matmuls + VPU tail
        transcendentals=0,
        bytes_accessed=int(4 * b_pad * D * 4 + b_pad * 4 + (3 * D * D + 5 * D + 1) * 4),
    )

    out = pl.pallas_call(
        neumf_kernel,
        out_shape=jax.ShapeDtypeStruct((b_pad, 1), jnp.float32),
        grid=(n_tiles,),
        in_specs=in_specs,
        out_specs=pl.BlockSpec((tile_b, 1), lambda i: (i, 0)),
        compiler_params=pltpu.CompilerParams(
            dimension_semantics=("parallel",),      # megacore-shards batch on v7x
            vmem_limit_bytes=_VMEM_LIMIT_BYTES,     # explicit budget, safe on v7x
        ),
        cost_estimate=cost,
    )(*inputs)

    # torch: output.squeeze() -> shape [B]
    return jnp.squeeze(out[:B], axis=-1)


# ----------------------------------------------------------------------------- reference
def neumf_reference(params, users, items):
    """Pure-JAX reference (un-folded weights) for correctness checking."""
    u_mlp = jnp.take(params["user_emb_mlp"], users, axis=0)
    i_mlp = jnp.take(params["item_emb_mlp"], items, axis=0)
    u_gmf = jnp.take(params["user_emb_gmf"], users, axis=0)
    i_gmf = jnp.take(params["item_emb_gmf"], items, axis=0)

    gmf = u_gmf * i_gmf
    out_gmf = gmf @ params["w_gmf"] + params["b_gmf"]

    x = jnp.concatenate([u_mlp, i_mlp], axis=1)
    h = jnp.maximum(x @ params["w1"] + params["b1"], 0.0)
    h = jnp.maximum(h @ params["w2"] + params["b2"], 0.0)
    out_mlp = h @ params["w3"] + params["b3"]

    out = jnp.concatenate([out_mlp, out_gmf], axis=1) @ params["w_final"] + params["b_final"]
    return jnp.squeeze(out, axis=-1)


if __name__ == "__main__":
    n_users, n_items, embedding_dim = 50, 60, 32

    key = jax.random.PRNGKey(0)
    pkey, ukey, ikey, ukey2, ikey2 = jax.random.split(key, 5)
    params = init_neumf_params(pkey, n_users, n_items, embedding_dim)

    # --- small batch (single tile, auto tile size) ---
    batch = 8
    users = jax.random.randint(ukey, (batch,), 0, n_users, dtype=jnp.int32)
    items = jax.random.randint(ikey, (batch,), 0, n_items, dtype=jnp.int32)

    out = jax.block_until_ready(neumf_forward(params, users, items))
    ref = neumf_reference(params, users, items)
    assert out.shape == (batch,)
    assert jnp.allclose(out, ref, atol=1e-5, rtol=1e-5), (out, ref)

    # --- larger batch exercising multi-step grid, resident weights and padding ---
    batch2 = 300
    users2 = jax.random.randint(ukey2, (batch2,), 0, n_users, dtype=jnp.int32)
    items2 = jax.random.randint(ikey2, (batch2,), 0, n_items, dtype=jnp.int32)

    out2 = jax.block_until_ready(neumf_forward(params, users2, items2, tile_b=128))
    ref2 = neumf_reference(params, users2, items2)
    assert out2.shape == (batch2,)
    assert jnp.allclose(out2, ref2, atol=1e-5, rtol=1e-5), (out2, ref2)

    # --- same batch with the auto-sized tile (single step, padded) ---
    out3 = jax.block_until_ready(neumf_forward(params, users2, items2))
    assert out3.shape == (batch2,)
    assert jnp.allclose(out3, ref2, atol=1e-5, rtol=1e-5), (out3, ref2)

    print("KERNEL_OK")
</pallas_src>

<mosaic_0001>
module attributes {stable_mosaic.version = 11 : i64} {
  func.func @neumf_kernel(%arg0: i32, %arg1: memref<8x32xf32, #tpu.memory_space<vmem>>, %arg2: memref<8x32xf32, #tpu.memory_space<vmem>>, %arg3: memref<8x32xf32, #tpu.memory_space<vmem>>, %arg4: memref<8x32xf32, #tpu.memory_space<vmem>>, %arg5: memref<32x32xf32, #tpu.memory_space<vmem>>, %arg6: memref<32x32xf32, #tpu.memory_space<vmem>>, %arg7: memref<1x32xf32, #tpu.memory_space<vmem>>, %arg8: memref<32x32xf32, #tpu.memory_space<vmem>>, %arg9: memref<1x32xf32, #tpu.memory_space<vmem>>, %arg10: memref<1x32xf32, #tpu.memory_space<vmem>>, %arg11: memref<1x32xf32, #tpu.memory_space<vmem>>, %arg12: memref<1x1xf32, #tpu.memory_space<vmem>>, %arg13: memref<8x1xf32, #tpu.memory_space<vmem>>) attributes {dimension_semantics = [#tpu.dimension_semantics<parallel>], iteration_bounds = array<i64: 1>, scalar_prefetch = 0 : i64, scratch_operands = 0 : i64, tpu.core_type = #tpu.core_type<tc>, window_params = [{transform_indices = @transform_0, window_bounds = array<i64: 8, 32>}, {transform_indices = @transform_1, window_bounds = array<i64: 8, 32>}, {transform_indices = @transform_2, window_bounds = array<i64: 8, 32>}, {transform_indices = @transform_3, window_bounds = array<i64: 8, 32>}, {pipeline_mode = #tpu.pipeline_mode<synchronous>, transform_indices = @transform_4, window_bounds = array<i64: 32, 32>}, {pipeline_mode = #tpu.pipeline_mode<synchronous>, transform_indices = @transform_5, window_bounds = array<i64: 32, 32>}, {pipeline_mode = #tpu.pipeline_mode<synchronous>, transform_indices = @transform_6, window_bounds = array<i64: 1, 32>}, {pipeline_mode = #tpu.pipeline_mode<synchronous>, transform_indices = @transform_7, window_bounds = array<i64: 32, 32>}, {pipeline_mode = #tpu.pipeline_mode<synchronous>, transform_indices = @transform_8, window_bounds = array<i64: 1, 32>}, {pipeline_mode = #tpu.pipeline_mode<synchronous>, transform_indices = @transform_9, window_bounds = array<i64: 1, 32>}, {pipeline_mode = #tpu.pipeline_mode<synchronous>, transform_indices = @transform_10, window_bounds = array<i64: 1, 32>}, {pipeline_mode = #tpu.pipeline_mode<synchronous>, transform_indices = @transform_11, window_bounds = array<i64: 1, 1>}, {transform_indices = @transform_12, window_bounds = array<i64: 8, 1>}]} {
    %c0 = arith.constant 0 : index
    %c0_0 = arith.constant 0 : index
    %0 = vector.load %arg1[%c0, %c0_0] : memref<8x32xf32, #tpu.memory_space<vmem>>, vector<8x32xf32>
    %c0_1 = arith.constant 0 : index
    %c0_2 = arith.constant 0 : index
    %1 = vector.load %arg2[%c0_1, %c0_2] : memref<8x32xf32, #tpu.memory_space<vmem>>, vector<8x32xf32>
    %c0_3 = arith.constant 0 : index
    %c0_4 = arith.constant 0 : index
    %2 = vector.load %arg3[%c0_3, %c0_4] : memref<8x32xf32, #tpu.memory_space<vmem>>, vector<8x32xf32>
    %c0_5 = arith.constant 0 : index
    %c0_6 = arith.constant 0 : index
    %3 = vector.load %arg4[%c0_5, %c0_6] : memref<8x32xf32, #tpu.memory_space<vmem>>, vector<8x32xf32>
    %c0_7 = arith.constant 0 : index
    %c0_8 = arith.constant 0 : index
    %4 = vector.load %arg5[%c0_7, %c0_8] : memref<32x32xf32, #tpu.memory_space<vmem>>, vector<32x32xf32>
    %cst = arith.constant dense<0.000000e+00> : vector<8x32xf32>
    %5 = tpu.matmul %0, %4, %cst {dimension_numbers = #tpu.dot_dimension_numbers<[1], [0], [0], [1], [0, 0, 1, 1], [], []>} : vector<8x32xf32>, vector<32x32xf32>, vector<8x32xf32> -> vector<8x32xf32>
    %c0_9 = arith.constant 0 : index
    %c0_10 = arith.constant 0 : index
    %6 = vector.load %arg6[%c0_9, %c0_10] : memref<32x32xf32, #tpu.memory_space<vmem>>, vector<32x32xf32>
    %cst_11 = arith.constant dense<0.000000e+00> : vector<8x32xf32>
    %7 = tpu.matmul %1, %6, %cst_11 {dimension_numbers = #tpu.dot_dimension_numbers<[1], [0], [0], [1], [0, 0, 1, 1], [], []>} : vector<8x32xf32>, vector<32x32xf32>, vector<8x32xf32> -> vector<8x32xf32>
    %8 = arith.addf %5, %7 : vector<8x32xf32>
    %c0_12 = arith.constant 0 : index
    %c0_13 = arith.constant 0 : index
    %9 = vector.load %arg7[%c0_12, %c0_13] : memref<1x32xf32, #tpu.memory_space<vmem>>, vector<1x32xf32>
    %10 = vector.broadcast %9 : vector<1x32xf32> to vector<8x32xf32>
    %11 = arith.addf %8, %10 : vector<8x32xf32>
    %cst_14 = arith.constant 0.000000e+00 : f32
    %12 = vector.broadcast %cst_14 : f32 to vector<8x32xf32>
    %13 = arith.maximumf %11, %12 : vector<8x32xf32>
    %c0_15 = arith.constant 0 : index
    %c0_16 = arith.constant 0 : index
    %14 = vector.load %arg8[%c0_15, %c0_16] : memref<32x32xf32, #tpu.memory_space<vmem>>, vector<32x32xf32>
    %cst_17 = arith.constant dense<0.000000e+00> : vector<8x32xf32>
    %15 = tpu.matmul %13, %14, %cst_17 {dimension_numbers = #tpu.dot_dimension_numbers<[1], [0], [0], [1], [0, 0, 1, 1], [], []>} : vector<8x32xf32>, vector<32x32xf32>, vector<8x32xf32> -> vector<8x32xf32>
    %c0_18 = arith.constant 0 : index
    %c0_19 = arith.constant 0 : index
    %16 = vector.load %arg9[%c0_18, %c0_19] : memref<1x32xf32, #tpu.memory_space<vmem>>, vector<1x32xf32>
    %17 = vector.broadcast %16 : vector<1x32xf32> to vector<8x32xf32>
    %18 = arith.addf %15, %17 : vector<8x32xf32>
    %cst_20 = arith.constant 0.000000e+00 : f32
    %19 = vector.broadcast %cst_20 : f32 to vector<8x32xf32>
    %20 = arith.maximumf %18, %19 : vector<8x32xf32>
    %21 = arith.mulf %2, %3 : vector<8x32xf32>
    %c0_21 = arith.constant 0 : index
    %c0_22 = arith.constant 0 : index
    %22 = vector.load %arg10[%c0_21, %c0_22] : memref<1x32xf32, #tpu.memory_space<vmem>>, vector<1x32xf32>
    %23 = vector.broadcast %22 : vector<1x32xf32> to vector<8x32xf32>
    %24 = arith.mulf %20, %23 : vector<8x32xf32>
    %cst_23 = arith.constant dense<0.000000e+00> : vector<8xf32>
    %25 = vector.multi_reduction <add>, %24, %cst_23 [1] : vector<8x32xf32> to vector<8xf32>
    %26 = vector.shape_cast %25 : vector<8xf32> to vector<8x1xf32>
    %c0_24 = arith.constant 0 : index
    %c0_25 = arith.constant 0 : index
    %27 = vector.load %arg11[%c0_24, %c0_25] : memref<1x32xf32, #tpu.memory_space<vmem>>, vector<1x32xf32>
    %28 = vector.broadcast %27 : vector<1x32xf32> to vector<8x32xf32>
    %29 = arith.mulf %21, %28 : vector<8x32xf32>
    %cst_26 = arith.constant dense<0.000000e+00> : vector<8xf32>
    %30 = vector.multi_reduction <add>, %29, %cst_26 [1] : vector<8x32xf32> to vector<8xf32>
    %31 = vector.shape_cast %30 : vector<8xf32> to vector<8x1xf32>
    %32 = arith.addf %26, %31 : vector<8x1xf32>
    %c0_27 = arith.constant 0 : index
    %c0_28 = arith.constant 0 : index
    %33 = vector.load %arg12[%c0_27, %c0_28] : memref<1x1xf32, #tpu.memory_space<vmem>>, vector<1x1xf32>
    %34 = vector.broadcast %33 : vector<1x1xf32> to vector<8x1xf32>
    %35 = arith.addf %32, %34 : vector<8x1xf32>
    %c0_29 = arith.constant 0 : index
    %c0_30 = arith.constant 0 : index
    %36 = vector.load %arg13[%c0_29, %c0_30] : memref<8x1xf32, #tpu.memory_space<vmem>>, vector<8x1xf32>
    tpu.vector_store %arg13[%c0_29, %c0_30], %35 {strides = array<i32>} : memref<8x1xf32, #tpu.memory_space<vmem>>, vector<8x1xf32>,
    return
  }
  func.func @transform_0(%arg0: i32) -> (i32, i32) {
    %c0_i32 = arith.constant 0 : i32
    %c0_i32_0 = arith.constant 0 : i32
    return %arg0, %c0_i32 : i32, i32
  }
  func.func @transform_1(%arg0: i32) -> (i32, i32) {
    %c0_i32 = arith.constant 0 : i32
    %c0_i32_0 = arith.constant 0 : i32
    return %arg0, %c0_i32 : i32, i32
  }
  func.func @transform_2(%arg0: i32) -> (i32, i32) {
    %c0_i32 = arith.constant 0 : i32
    %c0_i32_0 = arith.constant 0 : i32
    return %arg0, %c0_i32 : i32, i32
  }
  func.func @transform_3(%arg0: i32) -> (i32, i32) {
    %c0_i32 = arith.constant 0 : i32
    %c0_i32_0 = arith.constant 0 : i32
    return %arg0, %c0_i32 : i32, i32
  }
  func.func @transform_4(%arg0: i32) -> (i32, i32) {
    %c0_i32 = arith.constant 0 : i32
    %c0_i32_0 = arith.constant 0 : i32
    %c0_i32_1 = arith.constant 0 : i32
    return %c0_i32, %c0_i32_0 : i32, i32
  }
  func.func @transform_5(%arg0: i32) -> (i32, i32) {
    %c0_i32 = arith.constant 0 : i32
    %c0_i32_0 = arith.constant 0 : i32
    %c0_i32_1 = arith.constant 0 : i32
    return %c0_i32, %c0_i32_0 : i32, i32
  }
  func.func @transform_6(%arg0: i32) -> (i32, i32) {
    %c0_i32 = arith.constant 0 : i32
    %c0_i32_0 = arith.constant 0 : i32
    %c0_i32_1 = arith.constant 0 : i32
    return %c0_i32, %c0_i32_0 : i32, i32
  }
  func.func @transform_7(%arg0: i32) -> (i32, i32) {
    %c0_i32 = arith.constant 0 : i32
    %c0_i32_0 = arith.constant 0 : i32
    %c0_i32_1 = arith.constant 0 : i32
    return %c0_i32, %c0_i32_0 : i32, i32
  }
  func.func @transform_8(%arg0: i32) -> (i32, i32) {
    %c0_i32 = arith.constant 0 : i32
    %c0_i32_0 = arith.constant 0 : i32
    %c0_i32_1 = arith.constant 0 : i32
    return %c0_i32, %c0_i32_0 : i32, i32
  }
  func.func @transform_9(%arg0: i32) -> (i32, i32) {
    %c0_i32 = arith.constant 0 : i32
    %c0_i32_0 = arith.constant 0 : i32
    %c0_i32_1 = arith.constant 0 : i32
    return %c0_i32, %c0_i32_0 : i32, i32
  }
  func.func @transform_10(%arg0: i32) -> (i32, i32) {
    %c0_i32 = arith.constant 0 : i32
    %c0_i32_0 = arith.constant 0 : i32
    %c0_i32_1 = arith.constant 0 : i32
    return %c0_i32, %c0_i32_0 : i32, i32
  }
  func.func @transform_11(%arg0: i32) -> (i32, i32) {
    %c0_i32 = arith.constant 0 : i32
    %c0_i32_0 = arith.constant 0 : i32
    %c0_i32_1 = arith.constant 0 : i32
    return %c0_i32, %c0_i32_0 : i32, i32
  }
  func.func @transform_12(%arg0: i32) -> (i32, i32) {
    %c0_i32 = arith.constant 0 : i32
    %c0_i32_0 = arith.constant 0 : i32
    return %arg0, %c0_i32 : i32, i32
  }
}

</mosaic_0001>

<bundles_post_ra>
// kernel: tpu_custom_call.1
= control target key start
LH: loop header
LB: loop body
LE: loop exit
PB: predicated region body
PF: predicated region fallthrough
CT: control target
= control target key end

     0   :  { %s772_s0 = inlined_call_operand.hbm [shape: f32[8,32], index: 0, kind: input, shape index: {}]   ;;  %s773_s1 = inlined_call_operand.hbm [shape: f32[8,32], index: 1, kind: input, shape index: {}]   ;;  %s774_s2 = inlined_call_operand.hbm [shape: f32[8,32], index: 2, kind: input, shape index: {}]   ;;  %s775_s3 = inlined_call_operand.hbm [shape: f32[8,32], index: 3, kind: input, shape index: {}]   ;;  %s776_s4 = inlined_call_operand.hbm [shape: f32[32,32], index: 4, kind: input, shape index: {}]   ;;  %s777_s5 = inlined_call_operand.hbm [shape: f32[32,32], index: 5, kind: input, shape index: {}]   ;;  %s778_s6 = inlined_call_operand.vmem [shape: f32[1,32], index: 6, kind: input, shape index: {}]   ;;  %s779_s7 = inlined_call_operand.hbm [shape: f32[32,32], index: 7, kind: input, shape index: {}]   ;;  %s780_s8 = inlined_call_operand.vmem [shape: f32[1,32], index: 8, kind: input, shape index: {}]   ;;  %s781_s9 = inlined_call_operand.vmem [shape: f32[1,32], index: 9, kind: input, shape index: {}]   ;;  %s782_s10 = inlined_call_operand.vmem [shape: f32[1,32], index: 10, kind: input, shape index: {}]   ;;  %s783_s11 = inlined_call_operand.<no memory space> [shape: f32[1,1], index: 11, kind: input, shape index: {}]   ;;  %s784_s12 = inlined_call_operand.vmem [shape: f32[8,1], index: 12, kind: output, shape index: {}]  }
   0x1   :  { %v17_v0 = vstv %s783_s11 }
   0x2   :  { %18 = vst [vmem:[#allocation2] sm:$0x1] %v17_v0 }
   0x3   :  { %19 = vsyncpa [#allocation4], 0 }
   0x4   :  { %20 = vsyncpa [#allocation6], 0 }
   0x5   :  { %21 = vsyncpa [#allocation9], 0 }
   0x6   :  { %22 = vsyncpa [#allocation12], 0  ;;  %s640_s23 = smov [#allocation5]   ;;  %s641_s25 = smov [#allocation8]  }
   0x7   :  { %s39_s24 = sshll.u32 %s640_s23, 4  ;;  %s59_s26 = sshll.u32 %s641_s25, 4  ;;  %s40_s24 = int_to_ptr.vmem [resolvable:$true] %s39_s24  ;;  %s60_s26 = int_to_ptr.vmem [resolvable:$true] %s59_s26 }
   0x8   :  { %s500_s27 = scalar_lea.vmem %s40_s24, 128  ;;  %p505_p1 = scmp.lt.s32.totalorder %s40_s24, %s40_s24 }
   0x9   :  { %p501_p0 = scmp.ne.s32.totalorder %s40_s24, %s500_s27  ;;  %p506_p2 = scmp.lt.s32.totalorder %s500_s27, %s500_s27 }
   0xb   :  { %p507_p3 = por %p506_p2, %p505_p1 }
   0xd   :  { %p508_p4 = pnand %p507_p3, %p501_p0 }
   0xf   :  { %511 = shalt.err (!%p508_p4)
}
  0x10   :  { %42 = dma.hbm_to_vmem [thread:$0]  %s773_s1, 128, %s40_s24, [#allocation6]  }
  0x11   :  { %s520_s29 = scalar_lea.vmem %s60_s26, 128  ;;  %p525_p6 = scmp.lt.s32.totalorder %s60_s26, %s60_s26 }
  0x12   :  { %p521_p5 = scmp.ne.s32.totalorder %s60_s26, %s520_s29  ;;  %p526_p7 = scmp.lt.s32.totalorder %s520_s29, %s520_s29 }
  0x14   :  { %p527_p8 = por %p526_p7, %p525_p6 }
  0x16   :  { %p528_p9 = pnand %p527_p8, %p521_p5 }
  0x18   :  { %531 = shalt.err (!%p528_p9)
}
  0x19   :  { %62 = dma.hbm_to_vmem [thread:$0]  %s775_s3, 128, %s60_s26, [#allocation9]  }
  0x1a   :  { %s642_s14 = smov [#allocation11]   ;;  %s643_s16 = smov [#allocation3]  }
  0x1b   :  { %s80_s15 = sshll.u32 %s642_s14, 4  ;;  %s29_s17 = sshll.u32 %s643_s16, 4  ;;  %s81_s15 = int_to_ptr.vmem [resolvable:$true] %s80_s15  ;;  %s30_s17 = int_to_ptr.vmem [resolvable:$true] %s29_s17 }
  0x1c   :  { %s540_s18 = scalar_lea.vmem %s81_s15, 512  ;;  %p545_p11 = scmp.lt.s32.totalorder %s81_s15, %s81_s15 }
  0x1d   :  { %p541_p10 = scmp.ne.s32.totalorder %s81_s15, %s540_s18  ;;  %p546_p12 = scmp.lt.s32.totalorder %s540_s18, %s540_s18 }
  0x1f   :  { %p547_p13 = por %p546_p12, %p545_p11 }
  0x21   :  { %p548_p0 = pnand %p547_p13, %p541_p10 }
  0x23   :  { %551 = shalt.err (!%p548_p0)
}
  0x24   :  { %s644_s1 = smov 128   ;;  %s645_s19 = smov 8  }
  0x25   :  { %86 = dma.hbm_to_vmem [thread:$0]  %s777_s5, 512, %s81_s15, [#allocation12], %s644_s1, %s644_s1, %s645_s19  }
  0x26   :  { %s560_s21 = scalar_lea.vmem %s30_s17, 128  ;;  %p565_p2 = scmp.lt.s32.totalorder %s30_s17, %s30_s17 }
  0x27   :  { %p561_p1 = scmp.ne.s32.totalorder %s30_s17, %s560_s21  ;;  %p566_p3 = scmp.lt.s32.totalorder %s560_s21, %s560_s21 }
  0x29   :  { %p567_p4 = por %p566_p3, %p565_p2 }
  0x2b   :  { %p568_p5 = pnand %p567_p4, %p561_p1 }
  0x2d   :  { %571 = shalt.err (!%p568_p5)
}
  0x2e   :  { %32 = dma.hbm_to_vmem [thread:$0]  %s772_s0, 128, %s30_s17, [#allocation4]  }
  0x2f   :  { %s646_s24 = smov [#allocation7]   ;;  %s647_s26 = smov [#allocation10]  }
  0x30   :  { %s49_s25 = sshll.u32 %s646_s24, 4  ;;  %s68_s27 = sshll.u32 %s647_s26, 4  ;;  %s50_s25 = int_to_ptr.vmem [resolvable:$true] %s49_s25  ;;  %s69_s27 = int_to_ptr.vmem [resolvable:$true] %s68_s27 }
  0x31   :  { %s580_s28 = scalar_lea.vmem %s50_s25, 128  ;;  %p585_p7 = scmp.lt.s32.totalorder %s50_s25, %s50_s25 }
  0x32   :  { %p581_p6 = scmp.ne.s32.totalorder %s50_s25, %s580_s28  ;;  %p586_p8 = scmp.lt.s32.totalorder %s580_s28, %s580_s28 }
  0x34   :  { %p587_p9 = por %p586_p8, %p585_p7 }
  0x36   :  { %p588_p10 = pnand %p587_p9, %p581_p6 }
  0x38   :  { %591 = shalt.err (!%p588_p10)
}
  0x39   :  { %52 = dma.hbm_to_vmem [thread:$0]  %s774_s2, 128, %s50_s25, [#allocation6]  }
  0x3a   :  { %s600_s29 = scalar_lea.vmem %s69_s27, 512  ;;  %p605_p12 = scmp.lt.s32.totalorder %s69_s27, %s69_s27 }
  0x3b   :  { %p601_p11 = scmp.ne.s32.totalorder %s69_s27, %s600_s29  ;;  %p606_p13 = scmp.lt.s32.totalorder %s600_s29, %s600_s29 }
  0x3d   :  { %p607_p0 = por %p606_p13, %p605_p12 }
  0x3f   :  { %p608_p1 = pnand %p607_p0, %p601_p11 }
  0x41   :  { %611 = shalt.err (!%p608_p1)
}
  0x42   :  { %74 = dma.hbm_to_vmem [thread:$0]  %s776_s4, 512, %s69_s27, [#allocation9], %s644_s1, %s644_s1, %s645_s19  }
  0x43   :  { %s648_s13 = smov [#allocation13]  }
  0x44   :  { %s94_s14 = sshll.u32 %s648_s13, 4  ;;  %s95_s14 = int_to_ptr.vmem [resolvable:$true] %s94_s14 }
  0x45   :  { %s620_s15 = scalar_lea.vmem %s95_s14, 512  ;;  %p625_p3 = scmp.lt.s32.totalorder %s95_s14, %s95_s14 }
  0x46   :  { %p621_p2 = scmp.ne.s32.totalorder %s95_s14, %s620_s15  ;;  %p626_p4 = scmp.lt.s32.totalorder %s620_s15, %s620_s15 }
  0x48   :  { %p627_p5 = por %p626_p4, %p625_p3 }
  0x4a   :  { %p628_p6 = pnand %p627_p5, %p621_p2 }
  0x4c   :  { %631 = shalt.err (!%p628_p6)
}
  0x4d   :  { %100 = dma.hbm_to_vmem [thread:$0]  %s779_s7, 512, %s95_s14, [#allocation12], %s644_s1, %s644_s1, %s645_s19  }
  0x4e   :  { %632 = dma.done.wait [#allocation4], 128  }
  0x4f   :  { %633 = vsyncadd [#allocation4], 4294967168 }
  0x50   :  { %634 = dma.done.wait [#allocation6], 256  }
  0x51   :  { %635 = vsyncadd [#allocation6], 4294967040 }
  0x52   :  { %636 = dma.done.wait [#allocation9], 640  }
  0x53   :  { %637 = vsyncadd [#allocation9], 4294966656 }
  0x54   :  { %638 = dma.done.wait [#allocation12], 1024  }
  0x55   :  { %639 = vsyncadd [#allocation12], 4294966272  ;;  %v649_v1 = vmov 0.0   ;;  %vm650_vm0 = vmmov 0   ;;  %v141_v2 = vld [vmem:[#allocation11 + $0x18] sm:$0xff]  ;;  %v140_v4 = vld [vmem:[#allocation11 + $0x10] sm:$0xff] }
  0x56   :  { %448 = vmatprep.subr.mxu0 %v649_v1  ;;  %459 = vmatprep.subr.mxu1 %v649_v1  ;;  %v137_v3 = vld [vmem:[#allocation10 + $0x18] sm:$0xff]  ;;  %v136_v5 = vld [vmem:[#allocation10 + $0x10] sm:$0xff]  ;;  %v139_v6 = vld [vmem:[#allocation11 + $0x8] sm:$0xff]  ;;  %vm142_vm1 = vcmask 261120   ;;  %vm415_vm2 = vcmask 7168  }
  0x57   :  { %456 = vmatprep.mubr.msk.f32.mxu0 %vm650_vm0, %v649_v1  ;;  %467 = vmatprep.mubr.msk.f32.mxu1 %vm650_vm0, %v649_v1  ;;  %v135_v7 = vld [vmem:[#allocation10 + $0x8] sm:$0xff]  ;;  %v138_v8 = vld [vmem:[#allocation11] sm:$0xff]  ;;  %v301_v12 = vld [vmem:[#allocation13 + $0x18] sm:$0xff] }
  0x58   :  { %449 = vmatpush3.msra.mxu0 %v141_v2  ;;  %460 = vmatpush3.msra.mxu1 %v137_v3  ;;  %v134_v9 = vld [vmem:[#allocation10] sm:$0xff]  ;;  %v131_v10 = vld [vmem:[#allocation5] sm:$0xff]  ;;  %v300_v13 = vld [vmem:[#allocation13 + $0x10] sm:$0xff] }
  0x59   :  { %450 = vmatprep.subr.mxu0 %v649_v1  ;;  %461 = vmatprep.subr.mxu1 %v649_v1  ;;  %v130_v11 = vld [vmem:[#allocation3] sm:$0xff]  ;;  %v299_v14 = vld [vmem:[#allocation13 + $0x8] sm:$0xff]  ;;  %v427_v18 = vld [vmem:[%s778_s6] ss:$0 sm:$0xff] }
  0x5a   :  { %451 = vmatpush3.msra.mxu0 %v140_v4  ;;  %462 = vmatpush3.msra.mxu1 %v136_v5  ;;  %v298_v15 = vld [vmem:[#allocation13] sm:$0xff]  ;;  %v428_v24 = vld [vmem:[%s780_s8] ss:$0 sm:$0xff]  ;;  %v132_v25 = vld [vmem:[#allocation7] sm:$0xff] }
  0x5b   :  { %452 = vmatprep.subr.mxu0 %v649_v1  ;;  %463 = vmatprep.subr.mxu1 %v649_v1  ;;  %v133_v26 = vld [vmem:[#allocation8] sm:$0xff] }
  0x5c   :  { %453 = vmatpush3.msra.mxu0 %v139_v6  ;;  %464 = vmatpush3.msra.mxu1 %v135_v7  ;;  %v383_v29 = vmul.f32 %v133_v26, %v132_v25  ;;  %v430_v31 = vld [vmem:[%s781_s9] ss:$0 sm:$0xff] }
  0x5d   :  { %454 = vmatprep.subr.mxu0 %v649_v1  ;;  %465 = vmatprep.subr.mxu1 %v649_v1  ;;  %v431_v32 = vld [vmem:[%s782_s10] ss:$0 sm:$0xff] }
  0x5e   :  { %455 = vmatpush3.msra.mxu0 %v138_v8  ;;  %466 = vmatpush3.msra.mxu1 %v134_v9  ;;  %v402_v35 = vmul.f32 %v431_v32, %v383_v29  ;;  %v432_v39 = vld [vmem:[#allocation2] ss:$0 sm:$0xff] }
  0x5f   :  { %457 = vmatmul.mubr.msk.f32.vlgmr.msra.gmra.mxu0 %vm142_vm1, %v131_v10  ;;  %468 = vmatmul.mubr.msk.f32.vlgmr.msra.gmra.mxu1 %vm142_vm1, %v130_v11 }
  0x60   :  { %470 = vmatprep.subr.mxu0 %v649_v1  ;;  %478 = vmatprep.mubr.msk.f32.mxu0 %vm650_vm0, %v649_v1  ;;  %v403_v37 = vsel %vm142_vm1, %v402_v35, 0.0 }
  0x61   :  { %471 = vmatpush3.msra.mxu0 %v301_v12 }
  0x62   :  { %472 = vmatprep.subr.mxu0 %v649_v1 }
  0x63   :  { %473 = vmatpush3.msra.mxu0 %v300_v13 }
  0x64   :  { %474 = vmatprep.subr.mxu0 %v649_v1 }
  0x65   :  { %475 = vmatpush3.msra.mxu0 %v299_v14 }
  0x66   :  { %476 = vmatprep.subr.mxu0 %v649_v1 }
  0x67   :  { %477 = vmatpush3.msra.mxu0 %v298_v15 }
 0x11f   :  { %v212_v16 = vpop.f32.mrf.mxu0  ;;  %v285_v17 = vpop.f32.mrf.mxu1 }
 0x120   :  { %v286_v19 = vadd.f32 %v285_v17, %v212_v16 }
 0x121   :  { %v458_v20 = vpop.f32.mrf.mxu0  ;;  %v469_v21 = vpop.f32.mrf.mxu1 }
 0x122   :  { %v296_v22 = vadd.f32 %v427_v18, %v286_v19 }
 0x124   :  { %v297_v23 = vmax.f32 %v296_v22, 0.0 }
 0x126   :  { %479 = vmatmul.mubr.msk.f32.vlgmr.msra.gmra.mxu0 %vm142_vm1, %v297_v23 }
 0x1e6   :  { %v378_v27 = vpop.f32.mrf.mxu0 }
 0x1e7   :  { %v379_v28 = vadd.f32 %v428_v24, %v378_v27 }
 0x1e8   :  { %v480_v30 = vpop.f32.mrf.mxu0 }
 0x1e9   :  { %v382_v33 = vmax.f32 %v379_v28, 0.0 }
 0x1eb   :  { %v391_v34 = vmul.f32 %v430_v31, %v382_v33 }
 0x1ed   :  { %v392_v36 = vsel %vm142_vm1, %v391_v34, 0.0 }
 0x1ee   :  { %393 = vadd.xlane.f32.xlu0 %v392_v36 }
 0x1f2   :  { %404 = vadd.xlane.f32.xlu0 %v403_v37 }
 0x277   :  { %v394_v38 = vpop.xlane.xlu0 %393 }
 0x27b   :  { %v405_v40 = vpop.xlane.xlu0 %404 }
 0x27c   :  { %v406_v41 = vadd.f32 %v405_v40, %v394_v38 }
 0x27e   :  { %v414_v42 = vadd.f32 %v432_v39, %v406_v41 }
 0x280   :  { %416 = vst.msk [vmem:[%s784_s12] sm:$0xff] %vm415_vm2, %v414_v42 }
 0x281   :  { %421 = vsyncpa [#allocation4], 1 }
 0x282   :  { %422 = vsyncpa [#allocation6], 1 }
 0x283   :  { %423 = vsyncpa [#allocation9], 1 }
 0x284   :  { %424 = vsyncpa [#allocation12], 1 }

</bundles_post_ra>
